<compile_context>
chip_gen: v6e
topology: v6e:2x2x1
jax: 0.10.0
libtpu: 0.0.40
codegen_flags: <defaults>
</compile_context>

<pallas_src>
import functools

import jax
import jax.numpy as jnp
from jax.experimental import pallas as pl
from jax.experimental.pallas import tpu as pltpu

INPUT_SIZE = 25
K_PAD = 32          # layer-1 K padded to an 8-aligned width (pad col 25 = bias column)
H1 = 128
H2 = 64
OUT = 8


def _mlp_kernel(x_ref, w1_ref, w2_ref, b2_ref, w3_ref, b3_ref, o_ref, xpad_ref):
    blk = x_ref.shape[0]

    # Stage the raw f32 x tile into a K=32 bf16 slab in VMEM:
    #   lanes [0:25)  <- x (cast to bf16)
    #   lane   25     <- 1.0   (bias-fold column: b1 lives in row 25 of padded w1)
    #   lanes [26:32) <- 0.0
    # Both stores start at lane 0 (full store + masked store), so lowering is cheap.
    col = jax.lax.broadcasted_iota(jnp.int32, (blk, K_PAD), 1)
    xpad_ref[...] = jnp.where(col == INPUT_SIZE, 1.0, 0.0).astype(jnp.bfloat16)
    xpad_ref[:, :INPUT_SIZE] = x_ref[...].astype(jnp.bfloat16)

    # Layer 1: Linear(25->128) (bias folded into the matmul) + ReLU.
    # Dropout(0.2) -> identity (eval mode).  bf16 operands, f32 MXU accumulation.
    h1 = jnp.dot(xpad_ref[...], w1_ref[...], preferred_element_type=jnp.float32)
    h1 = jnp.maximum(h1, 0.0)

    # Layer 2: Linear(128->64) + ReLU.   Dropout(0.2) -> identity (eval mode).
    h2 = jnp.dot(h1.astype(jnp.bfloat16), w2_ref[...],
                 preferred_element_type=jnp.float32)
    h2 = jnp.maximum(h2 + b2_ref[...], 0.0)

    # Layer 3: Linear(64->8) — logits (f32 epilogue, cast to the output dtype).
    out = jnp.dot(h2.astype(jnp.bfloat16), w3_ref[...],
                  preferred_element_type=jnp.float32)
    o_ref[...] = (out + b3_ref[...]).astype(o_ref.dtype)


def _round_up(x, m):
    return (x + m - 1) // m * m


def _fold_w1(params):
    """Pad w1 K: 25 -> 32 and fold b1 into row 25 (matches the in-kernel ones column)."""
    w1p = jnp.zeros((K_PAD, H1), jnp.float32)
    w1p = w1p.at[:INPUT_SIZE, :].set(params["w1"])
    w1p = w1p.at[INPUT_SIZE, :].set(params["b1"].reshape(H1))
    return w1p.astype(jnp.bfloat16)


@functools.partial(jax.jit, static_argnames=("block_b", "out_dtype"))
def classification_model(x, params, block_b=None, out_dtype=jnp.float32):
    """x: (B, 25) float32; params: dict of w1,b1,w2,b2,w3,b3 (w stored as (in, out))."""
    B, F = x.shape
    assert F == INPUT_SIZE

    if block_b is None:
        if B <= 16:
            block_b = B                      # single (full-batch) block for tiny batches
        else:
            # Big tiles amortize the ~0.35us per-grid-step overhead (cap 8192 rows,
            # ~12 MiB VMEM incl. f32 intermediates); aim for >= 4 grid steps when B
            # allows so both v7x TensorCores get >= 2 steps each (DMA/compute overlap).
            block_b = max(16, min(8192, _round_up(pl.cdiv(B, 4), 16)))

    # Weight prep (tiny arrays, negligible): bf16 matmul operands, f32 b2/b3 epilogue.
    w1 = _fold_w1(params)
    w2 = params["w2"].astype(jnp.bfloat16)
    w3 = params["w3"].astype(jnp.bfloat16)
    b2, b3 = params["b2"], params["b3"]

    grid = (pl.cdiv(B, block_b),)            # ragged last block: OOB rows are
                                             # independent and OOB output writes are
                                             # dropped — no batch padding, no out[:B].

    # Constant block index across the grid -> fetched once, kept VMEM-resident.
    resident = lambda shape: pl.BlockSpec(shape, lambda i: (0, 0))

    out = pl.pallas_call(
        _mlp_kernel,
        out_shape=jax.ShapeDtypeStruct((B, OUT), out_dtype),
        grid_spec=pltpu.PrefetchScalarGridSpec(
            num_scalar_prefetch=0,
            grid=grid,
            in_specs=[
                pl.BlockSpec((block_b, INPUT_SIZE), lambda i: (i, 0)),  # raw f32 x tile
                resident((K_PAD, H1)),                                  # w1 (+ folded b1)
                resident((H1, H2)), resident((1, H2)),                  # w2, b2
                resident((H2, OUT)), resident((1, OUT)),                # w3, b3
            ],
            out_specs=pl.BlockSpec((block_b, OUT), lambda i: (i, 0)),
            scratch_shapes=[pltpu.VMEM((block_b, K_PAD), jnp.bfloat16)],  # padded x slab
        ),
        compiler_params=pltpu.CompilerParams(
            dimension_semantics=("parallel",),
            vmem_limit_bytes=64 << 20,   # headroom for 8K-row tiles (v5e default is 16 MiB)
        ),
    )(x, w1, w2, b2, w3, b3)
    return out


def init_params(key):
    """Deterministic parameter init matching nn.Linear shapes (stored transposed)."""
    ks = jax.random.split(key, 6)

    def linear(kw, kb, fan_in, fan_out):
        bound = 1.0 / jnp.sqrt(fan_in)
        w = jax.random.uniform(kw, (fan_in, fan_out), jnp.float32, -bound, bound)
        b = jax.random.uniform(kb, (1, fan_out), jnp.float32, -bound, bound)
        return w, b

    w1, b1 = linear(ks[0], ks[1], INPUT_SIZE, H1)
    w2, b2 = linear(ks[2], ks[3], H1, H2)
    w3, b3 = linear(ks[4], ks[5], H2, OUT)
    return dict(w1=w1, b1=b1, w2=w2, b2=b2, w3=w3, b3=b3)


def reference(x, p):
    """Pure-JAX reference mirroring the kernel's numerics (bf16 matmul operands with
    the layer-1 bias folded via a ones column, f32 accumulation, f32 epilogues)."""
    B = x.shape[0]
    xpad = jnp.concatenate(
        [x.astype(jnp.bfloat16),
         jnp.ones((B, 1), jnp.bfloat16),
         jnp.zeros((B, K_PAD - INPUT_SIZE - 1), jnp.bfloat16)], axis=-1)
    h1 = jnp.maximum(
        jnp.dot(xpad, _fold_w1(p), preferred_element_type=jnp.float32), 0.0)
    h2 = jnp.maximum(
        jnp.dot(h1.astype(jnp.bfloat16), p["w2"].astype(jnp.bfloat16),
                preferred_element_type=jnp.float32) + p["b2"], 0.0)
    return (jnp.dot(h2.astype(jnp.bfloat16), p["w3"].astype(jnp.bfloat16),
                    preferred_element_type=jnp.float32) + p["b3"])


if __name__ == "__main__":
    key = jax.random.PRNGKey(0)
    k_x, k_p = jax.random.split(key)

    # B = 50: not a multiple of the 16-row tile, so the ragged last block (dropped OOB
    # output writes), the in-kernel K=25->32 pad/cast, and a 4-step "parallel" grid
    # are all exercised.
    B = 50
    x = jax.random.normal(k_x, (B, INPUT_SIZE), jnp.float32)
    params = init_params(k_p)

    out = classification_model(x, params)
    jax.block_until_ready(out)

    ref = reference(x, params)
    assert out.shape == (B, OUT), out.shape
    assert out.dtype == jnp.float32, out.dtype
    assert jnp.allclose(out, ref, atol=1e-2, rtol=1e-2), "mismatch vs reference"

    print("KERNEL_OK")
</pallas_src>

<mosaic_0001>
module attributes {stable_mosaic.version = 11 : i64} {
  func.func @_mlp_kernel(%arg0: i32, %arg1: memref<16x25xf32, #tpu.memory_space<vmem>>, %arg2: memref<32x128xbf16, #tpu.memory_space<vmem>>, %arg3: memref<128x64xbf16, #tpu.memory_space<vmem>>, %arg4: memref<1x64xf32, #tpu.memory_space<vmem>>, %arg5: memref<64x8xbf16, #tpu.memory_space<vmem>>, %arg6: memref<1x8xf32, #tpu.memory_space<vmem>>, %arg7: memref<16x8xf32, #tpu.memory_space<vmem>>, %arg8: memref<16x32xbf16, #tpu.memory_space<vmem>>) attributes {dimension_semantics = [#tpu.dimension_semantics<parallel>], iteration_bounds = array<i64: 4>, scalar_prefetch = 0 : i64, scratch_operands = 1 : i64, tpu.core_type = #tpu.core_type<tc>, window_params = [{transform_indices = @transform_0, window_bounds = array<i64: 16, 25>}, {pipeline_mode = #tpu.pipeline_mode<synchronous>, transform_indices = @transform_1, window_bounds = array<i64: 32, 128>}, {pipeline_mode = #tpu.pipeline_mode<synchronous>, transform_indices = @transform_2, window_bounds = array<i64: 128, 64>}, {pipeline_mode = #tpu.pipeline_mode<synchronous>, transform_indices = @transform_3, window_bounds = array<i64: 1, 64>}, {pipeline_mode = #tpu.pipeline_mode<synchronous>, transform_indices = @transform_4, window_bounds = array<i64: 64, 8>}, {pipeline_mode = #tpu.pipeline_mode<synchronous>, transform_indices = @transform_5, window_bounds = array<i64: 1, 8>}, {transform_indices = @transform_6, window_bounds = array<i64: 16, 8>}]} {
    %0 = tpu.iota {dimensions = array<i32: 1>} : vector<16x32xi32>
    %c25_i32 = arith.constant 25 : i32
    %1 = vector.broadcast %c25_i32 : i32 to vector<16x32xi32>
    %2 = arith.cmpi eq, %0, %1 : vector<16x32xi32>
    %cst = arith.constant 1.000000e+00 : f32
    %cst_0 = arith.constant 0.000000e+00 : f32
    %3 = vector.broadcast %cst : f32 to vector<16x32xf32>
    %4 = vector.broadcast %cst_0 : f32 to vector<16x32xf32>
    %5 = arith.select %2, %3, %4 : vector<16x32xi1>, vector<16x32xf32>
    %6 = arith.truncf %5 : vector<16x32xf32> to vector<16x32xbf16>
    %c0 = arith.constant 0 : index
    %c0_1 = arith.constant 0 : index
    %7 = vector.load %arg8[%c0, %c0_1] : memref<16x32xbf16, #tpu.memory_space<vmem>>, vector<16x32xbf16>
    tpu.vector_store %arg8[%c0, %c0_1], %6 {strides = array<i32>} : memref<16x32xbf16, #tpu.memory_space<vmem>>, vector<16x32xbf16>,
    %c0_2 = arith.constant 0 : index
    %c0_3 = arith.constant 0 : index
    %8 = vector.load %arg1[%c0_2, %c0_3] : memref<16x25xf32, #tpu.memory_space<vmem>>, vector<16x25xf32>
    %9 = arith.truncf %8 : vector<16x25xf32> to vector<16x25xbf16>
    %c0_4 = arith.constant 0 : index
    %c0_5 = arith.constant 0 : index
    %10 = vector.load %arg8[%c0_4, %c0_5] : memref<16x32xbf16, #tpu.memory_space<vmem>>, vector<16x25xbf16>
    tpu.vector_store %arg8[%c0_4, %c0_5], %9 {strides = array<i32>} : memref<16x32xbf16, #tpu.memory_space<vmem>>, vector<16x25xbf16>,
    %c0_6 = arith.constant 0 : index
    %c0_7 = arith.constant 0 : index
    %11 = vector.load %arg8[%c0_6, %c0_7] : memref<16x32xbf16, #tpu.memory_space<vmem>>, vector<16x32xbf16>
    %c0_8 = arith.constant 0 : index
    %c0_9 = arith.constant 0 : index
    %12 = vector.load %arg2[%c0_8, %c0_9] : memref<32x128xbf16, #tpu.memory_space<vmem>>, vector<32x128xbf16>
    %cst_10 = arith.constant dense<0.000000e+00> : vector<16x128xf32>
    %13 = tpu.matmul %11, %12, %cst_10 {dimension_numbers = #tpu.dot_dimension_numbers<[1], [0], [0], [1], [0, 0, 1, 1], [], []>} : vector<16x32xbf16>, vector<32x128xbf16>, vector<16x128xf32> -> vector<16x128xf32>
    %cst_11 = arith.constant 0.000000e+00 : f32
    %14 = vector.broadcast %cst_11 : f32 to vector<16x128xf32>
    %15 = arith.maximumf %13, %14 : vector<16x128xf32>
    %16 = arith.truncf %15 : vector<16x128xf32> to vector<16x128xbf16>
    %c0_12 = arith.constant 0 : index
    %c0_13 = arith.constant 0 : index
    %17 = vector.load %arg3[%c0_12, %c0_13] : memref<128x64xbf16, #tpu.memory_space<vmem>>, vector<128x64xbf16>
    %cst_14 = arith.constant dense<0.000000e+00> : vector<16x64xf32>
    %18 = tpu.matmul %16, %17, %cst_14 {dimension_numbers = #tpu.dot_dimension_numbers<[1], [0], [0], [1], [0, 0, 1, 1], [], []>} : vector<16x128xbf16>, vector<128x64xbf16>, vector<16x64xf32> -> vector<16x64xf32>
    %c0_15 = arith.constant 0 : index
    %c0_16 = arith.constant 0 : index
    %19 = vector.load %arg4[%c0_15, %c0_16] : memref<1x64xf32, #tpu.memory_space<vmem>>, vector<1x64xf32>
    %20 = vector.broadcast %19 : vector<1x64xf32> to vector<16x64xf32>
    %21 = arith.addf %18, %20 : vector<16x64xf32>
    %cst_17 = arith.constant 0.000000e+00 : f32
    %22 = vector.broadcast %cst_17 : f32 to vector<16x64xf32>
    %23 = arith.maximumf %21, %22 : vector<16x64xf32>
    %24 = arith.truncf %23 : vector<16x64xf32> to vector<16x64xbf16>
    %c0_18 = arith.constant 0 : index
    %c0_19 = arith.constant 0 : index
    %25 = vector.load %arg5[%c0_18, %c0_19] : memref<64x8xbf16, #tpu.memory_space<vmem>>, vector<64x8xbf16>
    %cst_20 = arith.constant dense<0.000000e+00> : vector<16x8xf32>
    %26 = tpu.matmul %24, %25, %cst_20 {dimension_numbers = #tpu.dot_dimension_numbers<[1], [0], [0], [1], [0, 0, 1, 1], [], []>} : vector<16x64xbf16>, vector<64x8xbf16>, vector<16x8xf32> -> vector<16x8xf32>
    %c0_21 = arith.constant 0 : index
    %c0_22 = arith.constant 0 : index
    %27 = vector.load %arg6[%c0_21, %c0_22] : memref<1x8xf32, #tpu.memory_space<vmem>>, vector<1x8xf32>
    %28 = vector.broadcast %27 : vector<1x8xf32> to vector<16x8xf32>
    %29 = arith.addf %26, %28 : vector<16x8xf32>
    %c0_23 = arith.constant 0 : index
    %c0_24 = arith.constant 0 : index
    %30 = vector.load %arg7[%c0_23, %c0_24] : memref<16x8xf32, #tpu.memory_space<vmem>>, vector<16x8xf32>
    tpu.vector_store %arg7[%c0_23, %c0_24], %29 {strides = array<i32>} : memref<16x8xf32, #tpu.memory_space<vmem>>, vector<16x8xf32>,
    return
  }
  func.func @transform_0(%arg0: i32) -> (i32, i32) {
    %c0_i32 = arith.constant 0 : i32
    %c0_i32_0 = arith.constant 0 : i32
    return %arg0, %c0_i32 : i32, i32
  }
  func.func @transform_1(%arg0: i32) -> (i32, i32) {
    %c0_i32 = arith.constant 0 : i32
    %c0_i32_0 = arith.constant 0 : i32
    %c0_i32_1 = arith.constant 0 : i32
    return %c0_i32, %c0_i32_0 : i32, i32
  }
  func.func @transform_2(%arg0: i32) -> (i32, i32) {
    %c0_i32 = arith.constant 0 : i32
    %c0_i32_0 = arith.constant 0 : i32
    %c0_i32_1 = arith.constant 0 : i32
    return %c0_i32, %c0_i32_0 : i32, i32
  }
  func.func @transform_3(%arg0: i32) -> (i32, i32) {
    %c0_i32 = arith.constant 0 : i32
    %c0_i32_0 = arith.constant 0 : i32
    %c0_i32_1 = arith.constant 0 : i32
    return %c0_i32, %c0_i32_0 : i32, i32
  }
  func.func @transform_4(%arg0: i32) -> (i32, i32) {
    %c0_i32 = arith.constant 0 : i32
    %c0_i32_0 = arith.constant 0 : i32
    %c0_i32_1 = arith.constant 0 : i32
    return %c0_i32, %c0_i32_0 : i32, i32
  }
  func.func @transform_5(%arg0: i32) -> (i32, i32) {
    %c0_i32 = arith.constant 0 : i32
    %c0_i32_0 = arith.constant 0 : i32
    %c0_i32_1 = arith.constant 0 : i32
    return %c0_i32, %c0_i32_0 : i32, i32
  }
  func.func @transform_6(%arg0: i32) -> (i32, i32) {
    %c0_i32 = arith.constant 0 : i32
    %c0_i32_0 = arith.constant 0 : i32
    return %arg0, %c0_i32 : i32, i32
  }
}

</mosaic_0001>

<bundles_post_ra>
// kernel: classification_model.1
= control target key start
LH: loop header
LB: loop body
LE: loop exit
PB: predicated region body
PF: predicated region fallthrough
CT: control target
= control target key end

     0   :  { %s1131_s21 = smov 0   ;;  %s1133_s22 = smov 0   ;;  %s1283_s0 = inlined_call_operand.vmem [shape: f32[50,25], index: 0, kind: input, shape index: {}]   ;;  %s1284_s1 = inlined_call_operand.vmem [shape: bf16[32,128], index: 1, kind: input, shape index: {}]   ;;  %s1285_s2 = inlined_call_operand.vmem [shape: bf16[128,64], index: 2, kind: input, shape index: {}]   ;;  %s1286_s3 = inlined_call_operand.vmem [shape: f32[1,64], index: 3, kind: input, shape index: {}]   ;;  %s1287_s4 = inlined_call_operand.vmem [shape: bf16[64,8], index: 4, kind: input, shape index: {}]   ;;  %s1288_s5 = inlined_call_operand.vmem [shape: f32[1,8], index: 5, kind: input, shape index: {}]   ;;  %s1289_s6 = inlined_call_operand.vmem [shape: f32[50,8], index: 6, kind: output, shape index: {}]  }
   0x1   :  { %s1135_s23 = smov 0  }
   0x2 LB: > { %s1144_s24 = sadd.s32 4294967295, %s1060_s23   ;;  %s1146_s25 = sadd.s32 1, %s1060_s23   ;;  %s1060_s23 = sphi %s1135_s23, %s1293_s23   ;;  %s1056_s22 = sphi %s1133_s22, %s1292_s22   ;;  %s1052_s21 = sphi %s1131_s21, %s1291_s21  }
   0x3   : > { %s151_s26 = ssub.s32 %s1060_s23, %s1146_s25  ;;  %s154_s27 = sadd.s32 1, %s1056_s22 }
   0x4   : > { %p152_p0 = scmp.eq.s32.totalorder %s151_s26, 0  ;;  %p164_p1 = scmp.ne.s32.totalorder %s1056_s22, %s1052_s21 }
   0x5   : > { %p165_p2 = scmp.eq.s32.totalorder %s1144_s24, 3  ;;  %p795_p3 = scmp.ge.s32.totalorder %s1060_s23, 1 }
   0x6   : > { %s1154_s28 = scalar_select %p152_p0, %s1056_s22, %s154_s27  }
   0x7   : > { %p1156_p4 = por %p165_p2, %p164_p1  ;;  %p221_p5 = scmp.lt.s32.totalorder %s1060_s23, 5 }
   0x9   : > { %p222_p6 = pnand %p795_p3, %p221_p5 }
   0xa   : > { %s1171_s10 = sshll.u32 (!%p222_p6), %s1144_s24, 1  ;;  %s251_s7 = sand.u32 (!%p222_p6), 1, %s1052_s21  }
   0xb   : > { %225 = sbr.rel (%p222_p6) target bundleno = 676 (0x2a4), region = 44  ;;  %p259_p7 = scmp.lt.s32.totalorder (!%p222_p6), %s1171_s10, 6 }
   0xc   : > { %s796_s8 = sshll.u32 (!%p222_p6), %s251_s7, 4 }
   0xd   : > { %s1238_s12 = scalar_lea.vmem (!%p222_p6), [#allocation3], %s796_s8  }
  0x10   : > { %v991_v0 = vld [vmem:[%s1284_s1 + $0x8] sm:$0xff]   ;;  %v274_v1 = vlaneseq  ;;  %v1094_v2 = vmov 0.0   ;;  %v992_v3 = vld [vmem:[%s1284_s1] sm:$0xff]   ;;  %vm1095_vm0 = vmmov 0   ;;  %v994_v5 = vld [vmem:[%s1285_s2 + $0x38] sm:$0xff]   ;;  %vm283_vm1 = vcmask 257024  }
  0x11   : > { %861 = vmatprep.subr.bf16.mxu0 %v1094_v2  ;;  %869 = vmatprep.subr.bf16.mxu1 %v1094_v2  ;;  %v995_v6 = vld [vmem:[%s1285_s2 + $0x30] sm:$0xff]   ;;  %s260_s15 = scalar_select %p259_p7, %s1171_s10, 6  ;;  %v996_v9 = vld [vmem:[%s1285_s2 + $0x28] sm:$0xff]   ;;  %vm296_vm3 = vcmask 199680   ;;  %v997_v14 = vld [vmem:[%s1285_s2 + $0x20] sm:$0xff]   ;;  %vm322_vm4 = vcmask 261120  }
  0x12   : > { %862 = vmatpush3.bf16.msra.mxu0 %v991_v0  ;;  %865 = vmatprep.mubr.msk.bf16.mxu0 %vm1095_vm0, %v1094_v2  ;;  %v275_v4 = vand.u32 127, %v274_v1  ;;  %v998_v15 = vld [vmem:[%s1285_s2 + $0x18] sm:$0xff]   ;;  %v999_v17 = vld [vmem:[%s1285_s2 + $0x10] sm:$0xff]   ;;  %v1000_v18 = vld [vmem:[%s1285_s2 + $0x8] sm:$0xff]   ;;  %vm524_vm5 = vcmask 523264   ;;  %vm569_vm6 = vcmask 64512  }
  0x13   : > { %863 = vmatprep.subr.bf16.mxu0 %v1094_v2  ;;  %885 = vmatprep.mubr.msk.bf16.mxu1 %vm1095_vm0, %v1094_v2  ;;  %s798_s16 = sshll.u32 %s260_s15, 3  ;;  %v1001_v19 = vld [vmem:[%s1285_s2] sm:$0xff]   ;;  %v1002_v20 = vld [vmem:[%s1287_s4 + $0x18] sm:$0xff]   ;;  %v1003_v28 = vld [vmem:[%s1287_s4 + $0x10] sm:$0xff]   ;;  %s580_s21 = ssub.s32 (%p1156_p4), 7, %s1171_s10 }
  0x14   : > { %vm276_vm2 = vcmp.eq.s32.totalorder %v275_v4, 25  ;;  %870 = vmatpush3.bf16.msra.mxu1 %v994_v5  ;;  %s262_s19 = scalar_lea.vmem %s1283_s0, %s798_s16  ;;  %v1004_v29 = vld [vmem:[%s1287_s4 + $0x8] sm:$0xff]   ;;  %v1005_v30 = vld [vmem:[%s1287_s4] sm:$0xff]   ;;  %s841_s13 = sshll.u32 (%p1156_p4), %s1144_s24, 4 }
  0x15   : > { %v277_v7 = vsel %vm276_vm2, 1.0, %v1094_v2  ;;  %871 = vmatprep.subr.bf16.mxu1 %v1094_v2  ;;  %v286_v10 = vld [vmem:[%s262_s19] sm:$0xff]  ;;  %v287_v11 = vld [vmem:[%s262_s19 + $0x8] sm:$0xff]  ;;  %p581_p8 = scmp.lt.s32.totalorder (%p1156_p4), %s580_s21, 2  ;;  %s1249_s16 = scalar_lea.vmem (%p1156_p4), %s1289_s6, %s841_s13  }
  0x16   : > { %864 = vmatpush3.bf16.msra.mxu0 %v992_v3  ;;  %v838_v8 = vpack.c.bf16 %v277_v7, %v277_v7  ;;  %v839_v12 = vpack.c.bf16 %v286_v10, %v286_v10  ;;  %v840_v13 = vpack.c.bf16 %v287_v11, %v287_v11  ;;  %v806_v31 = vld [vmem:[%s1286_s3] ss:$0 sm:$0xff] }
  0x17   : > { %889 = vmatprep.subr.bf16.mxu0 %v1094_v2  ;;  %v815_v41 = vld [vmem:[%s1288_s5] ss:$0 sm:$0xff] }
  0x18   : > { %284 = vst.msk [vmem:[#allocation2] sm:$0xf] %vm283_vm1, %v838_v8  ;;  %285 = vst.msk [vmem:[#allocation2 + $0x4] sm:$0xf] %vm283_vm1, %v838_v8  ;;  %872 = vmatpush3.bf16.msra.mxu1 %v995_v6 }
  0x19   : > { %873 = vmatprep.subr.bf16.mxu1 %v1094_v2  ;;  %297 = vst.msk [vmem:[#allocation2] sm:$0xf] %vm296_vm3, %v839_v12  ;;  %298 = vst.msk [vmem:[#allocation2 + $0x4] sm:$0xf] %vm296_vm3, %v840_v13 }
  0x1c   : > { %874 = vmatpush3.bf16.msra.mxu1 %v996_v9 }
  0x1d   : > { %875 = vmatprep.subr.bf16.mxu1 %v1094_v2 }
  0x20   : > { %876 = vmatpush3.bf16.msra.mxu1 %v997_v14  ;;  %v993_v16 = vld [vmem:[#allocation2] sm:$0xff]  }
  0x21   : > { %877 = vmatprep.subr.bf16.mxu1 %v1094_v2  ;;  %866 = vmatmul.mubr.msk.bf16.vlgmr.msra.gmra.mxu0 %vm322_vm4, %v993_v16 }
  0x22   : > { %897 = vmatprep.mubr.msk.bf16.mxu0 %vm1095_vm0, %v1094_v2  ;;  %890 = vmatpush3.bf16.msra.mxu0 %v1002_v20 }
  0x23   : > { %891 = vmatprep.subr.bf16.mxu0 %v1094_v2 }
  0x24   : > { %878 = vmatpush3.bf16.msra.mxu1 %v998_v15 }
  0x25   : > { %879 = vmatprep.subr.bf16.mxu1 %v1094_v2 }
  0x26   : > { %892 = vmatpush3.bf16.msra.mxu0 %v1003_v28 }
  0x27   : > { %893 = vmatprep.subr.bf16.mxu0 %v1094_v2 }
  0x28   : > { %880 = vmatpush3.bf16.msra.mxu1 %v999_v17 }
  0x29   : > { %881 = vmatprep.subr.bf16.mxu1 %v1094_v2 }
  0x2a   : > { %894 = vmatpush3.bf16.msra.mxu0 %v1004_v29 }
  0x2b   : > { %895 = vmatprep.subr.bf16.mxu0 %v1094_v2 }
  0x2c   : > { %882 = vmatpush3.bf16.msra.mxu1 %v1000_v18 }
  0x2d   : > { %883 = vmatprep.subr.bf16.mxu1 %v1094_v2 }
  0x2e   : > { %896 = vmatpush3.bf16.msra.mxu0 %v1005_v30 }
  0x30   : > { %884 = vmatpush3.bf16.msra.mxu1 %v1001_v19 }
  0xe1   : > { %v360_v21 = vpop.f32.mrf.mxu0 }
  0xe2   : > { %v367_v24 = vmax.f32 %v360_v21, 0.0 }
  0xe3   : > { %v867_v22 = vpop.f32.mrf.mxu0 }
  0xe5   : > { %v363_v23 = vpop.f32.mrf.mxu0 }
  0xe6   : > { %v368_v25 = vmax.f32 %v363_v23, 0.0 }
  0xe7   : > { %v868_v26 = vpop.f32.mrf.mxu0 }
  0xe8   : > { %v369_v27 = vpack.c.bf16 %v368_v25, %v367_v24 }
  0xea   : > { %886 = vmatmul.mubr.bf16.vlgmr.msra.gmra.mxu1 %v369_v27 }
 0x1aa   : > { %v475_v32 = vpop.f32.mrf.mxu1 }
 0x1ab   : > { %v476_v34 = vadd.f32 %v806_v31, %v475_v32 }
 0x1ac   : > { %v887_v33 = vpop.f32.mrf.mxu1 }
 0x1ad   : > { %v482_v38 = vmax.f32 %v476_v34, 0.0 }
 0x1ae   : > { %v478_v35 = vpop.f32.mrf.mxu1 }
 0x1af   : > { %v479_v36 = vadd.f32 %v806_v31, %v478_v35 }
 0x1b0   : > { %v888_v37 = vpop.f32.mrf.mxu1 }
 0x1b1   : > { %v483_v39 = vmax.f32 %v479_v36, 0.0 }
 0x1b3   : > { %v484_v40 = vpack.c.bf16 %v483_v39, %v482_v38 }
 0x1b5   : > { %898 = vmatmul.mubr.msk.bf16.vlgmr.msra.gmra.mxu0 %vm524_vm5, %v484_v40 }
 0x275   : > { %v562_v42 = vpop.f32.mrf.mxu0 }
 0x276   : > { %v563_v43 = vadd.f32 %v815_v41, %v562_v42 }
 0x277   : > { %v899_v44 = vpop.f32.mrf.mxu0 }
 0x278   : > { %570 = vst.msk [vmem:[%s1238_s12] sm:$0xff] %vm569_vm6, %v563_v43  ;;  %578 = sbr.rel (!%p1156_p4) target bundleno = 676 (0x2a4), region = 48 }
 0x279   : > { %v565_v45 = vpop.f32.mrf.mxu0 }
 0x27a   : > { %v566_v46 = vadd.f32 %v815_v41, %v565_v45 }
 0x27b   : > { %v900_v47 = vpop.f32.mrf.mxu0 }
 0x27c   : > { %571 = vst.msk [vmem:[%s1238_s12 + $0x8] sm:$0xff] %vm569_vm6, %v566_v46 }
 0x27d   : > { %s1295_s21 = smov (!%p581_p8, %s580_s21), 2 }
 0x27e   : > { %s823_s17 = sshll.u32 %s1295_s21, 7 }
 0x27f   : > { %p826_p9 = scmp.eq.s32.totalorder %s823_s17, 0 }
 0x280   : > { %s1255_s18 = sshrl.u32 (!%p826_p9), %s1295_s21, 1 }
 0x281   : > { %589 = sbr.rel (%p826_p9) target bundleno = 676 (0x2a4), region = 52  ;;  %p827_p10 = scmp.le.s32.totalorder (!%p826_p9), %s1255_s18, 0 }
 0x286   : > { %748 = sbr.rel (%p827_p10) target bundleno = 659 (0x293), region = 128  ;;  %s1062_s24 = smov (!%p827_p10), %s1249_s16  }
 0x287   : > { %s1066_s29 = smov (!%p827_p10), %s1238_s12   ;;  %s1070_s10 = smov (!%p827_p10), 0  }
 0x288   : > { %s1074_s19 = smov (!%p827_p10), 0  }
 0x28b LB: >> { %v654_v48 = vld [vmem:[%s1068_s29] sm:$0xff]  ;;  %v656_v49 = vld [vmem:[%s1068_s29 + $0x8] sm:$0xff]  ;;  %s658_s20 = sadd.s32 1, %s1072_s10  ;;  %s648_s19 = sadd.s32 1, %s1076_s19   ;;  %s1076_s19 = sphi %s1074_s19, %s648_s19   ;;  %s1072_s10 = sphi %s1070_s10, %s1071_s10   ;;  %s1068_s29 = sphi %s1066_s29, %s663_s29   ;;  %s1064_s24 = sphi %s1062_s24, %s664_s24  }
 0x28c   : >> { %655 = vst [vmem:[%s1064_s24] sm:$0xff] %v654_v48  ;;  %657 = vst [vmem:[%s1064_s24 + $0x8] sm:$0xff] %v656_v49  ;;  %p659_p11 = scmp.ge.s32.totalorder %s658_s20, %s1255_s18  ;;  %p647_p12 = scmp.ge.s32.totalorder %s648_s19, %s1255_s18 }
 0x28e   : >> { %s1297_s20 = smov (%p659_p11, %s658_s20), 0  ;;  %650 = sbr.rel (!%p647_p12) target bundleno = 651 (0x28b), region = 134 }
 0x28f   : >> { %s828_s23 = sshll.u32 %s1297_s20, 4  ;;  %s1071_s10 = smov %s1297_s20  }
 0x290   : >> { %s663_s29 = scalar_lea.vmem %s1238_s12, %s828_s23 [#allocation3]   ;;  %s664_s24 = scalar_lea.vmem %s1249_s16, %s828_s23  }
 0x293 PF: > { %s1265_s26 = sand.u32 1, %s1295_s21   ;;  %s842_s27 = sshll.u32 %s1255_s18, 4 }
 0x294   : > { %s669_s30 = scalar_lea.vmem %s1238_s12, %s842_s27 [#allocation3]   ;;  %s671_s7 = scalar_lea.vmem %s1249_s16, %s842_s27  }
 0x295   : > { %p833_p13 = scmp.le.s32.totalorder %s1265_s26, 0 }
 0x296   : > { %s1078_s8 = smov (!%p833_p13), %s671_s7   ;;  %s1082_s9 = smov (!%p833_p13), %s669_s30  }
 0x297   : > { %762 = sbr.rel (%p833_p13) target bundleno = 676 (0x2a4), region = 139  ;;  %s1086_s11 = smov (!%p833_p13), 0  }
 0x298   : > { %s1090_s13 = smov (!%p833_p13), 0  }
 0x29c LB: >> { %v681_v50 = vld [vmem:[%s1084_s9] sm:$0xff]  ;;  %s683_s21 = sadd.s32 1, %s1088_s11  ;;  %s675_s13 = sadd.s32 1, %s1092_s13   ;;  %s1092_s13 = sphi %s1090_s13, %s675_s13   ;;  %s1088_s11 = sphi %s1086_s11, %s1087_s11   ;;  %s1084_s9 = sphi %s1082_s9, %s688_s9   ;;  %s1080_s8 = sphi %s1078_s8, %s689_s8  }
 0x29d   : >> { %682 = vst [vmem:[%s1080_s8] sm:$0xff] %v681_v50  ;;  %p684_p0 = scmp.ge.s32.totalorder %s683_s21, %s1265_s26  ;;  %p674_p1 = scmp.ge.s32.totalorder %s675_s13, %s1265_s26 }
 0x29f   : >> { %s1299_s21 = smov (%p684_p0, %s683_s21), 0  ;;  %677 = sbr.rel (!%p674_p1) target bundleno = 668 (0x29c), region = 145 }
 0x2a0   : >> { %s834_s12 = sshll.u32 %s1299_s21, 3  ;;  %s1087_s11 = smov %s1299_s21  }
 0x2a1   : >> { %s688_s9 = scalar_lea.vmem %s669_s30, %s834_s12 [#allocation3]   ;;  %s689_s8 = scalar_lea.vmem %s671_s7, %s834_s12  }
 0x2a4 PF: > { %p13_p2 = scmp.ge.s32.totalorder %s1146_s25, 6   ;;  %s1291_s21 = smov %s1056_s22 }
 0x2a5   : > { %s1292_s22 = smov %s1154_s28  ;;  %s1293_s23 = smov %s1146_s25 }
 0x2a6   :  { %15 = sbr.rel (!%p13_p2) target bundleno = 2 (0x2), region = 156 }

</bundles_post_ra>
